<compile_context>
chip_gen: v7x
topology: tpu7x:2x2x1
jax: 0.10.0
libtpu: 0.0.40
codegen_flags: <defaults>
</compile_context>

<pallas_src>
import jax
import jax.numpy as jnp
from jax.experimental import pallas as pl
from jax.experimental.pallas import tpu as pltpu

N_HID = 5
N_SYMBOL = 26
N_TRANSFORM_LAYER = 0  # no transform layers in this config

LANE = 128
SYM_PAD = 128          # 26 output symbols padded to one full lane width


def _gather_kernel(idx_ref, tbl_ref, out_ref):
    # idx_ref : (1, TB)            int32  -- symbol ids, lane-major
    # tbl_ref : (SYM_PAD, SYM_PAD) f32    -- padded log_softmax(emb @ W.T + b).T
    # out_ref : (SYM_PAD, TB)      f32    -- out_T[s, b] = table[idx[b], s]
    tb = out_ref.shape[1]

    # one-hot (transposed): onehot[k, b] = (idx[b] == k); rows 26..127 are zero.
    sym = jax.lax.broadcasted_iota(jnp.int32, (SYM_PAD, tb), 0)     # (128, TB)
    onehot = (sym == idx_ref[...]).astype(jnp.float32)              # (128, TB)

    # Row gather via MXU: out_T = table.T @ onehot  -> (128, TB), lane-dense.
    out_ref[...] = jnp.dot(tbl_ref[...], onehot,
                           preferred_element_type=jnp.float32)


def net_forward(x, emb_table, out_weight, out_bias, *, tb=1024):
    """x: (B,) int32 symbol ids. Returns (B, N_SYMBOL) float32 log-probs."""
    assert tb % LANE == 0
    B = x.shape[0]

    # --- Fuse the whole net into a (26, 26) log-prob table (pure JAX, tiny). ---
    logits_tbl = emb_table @ out_weight.T + out_bias              # (26, 26)
    logp_tbl = jax.nn.log_softmax(logits_tbl, axis=1)             # row k = output for id k
    # Transpose so kernel output is (out_sym, batch); zero-pad to lane-dense 128x128.
    tbl_T = jnp.zeros((SYM_PAD, SYM_PAD), jnp.float32)
    tbl_T = tbl_T.at[:N_SYMBOL, :N_SYMBOL].set(logp_tbl.T.astype(jnp.float32))

    # --- Lane-major, lane-padded ids and batch tiling. ---
    b_lane = LANE * pl.cdiv(B, LANE)            # pad batch to a multiple of 128
    tb_eff = min(tb, b_lane)                    # cap tile for small batches
    b_pad = tb_eff * pl.cdiv(b_lane, tb_eff)    # pad batch to a multiple of the tile
    idx = jnp.zeros((1, b_pad), jnp.int32).at[0, :B].set(x.astype(jnp.int32))

    grid = (b_pad // tb_eff,)

    out_t = pl.pallas_call(
        _gather_kernel,
        out_shape=jax.ShapeDtypeStruct((SYM_PAD, b_pad), jnp.float32),
        grid_spec=pltpu.PrefetchScalarGridSpec(
            num_scalar_prefetch=0,
            grid=grid,
            in_specs=[
                pl.BlockSpec((1, tb_eff), lambda i: (0, i)),            # ids (lane-major)
                pl.BlockSpec((SYM_PAD, SYM_PAD), lambda i: (0, 0)),     # table, VMEM-resident
            ],
            out_specs=pl.BlockSpec((SYM_PAD, tb_eff), lambda i: (0, i)),
        ),
        compiler_params=pltpu.CompilerParams(
            dimension_semantics=("parallel",)),   # lets v7x shard tiles over both TCs
    )(idx, tbl_T)

    # Strip padding: (128, B_pad) -> (B, 26).
    return out_t[:N_SYMBOL, :B].T


def init_params(key):
    """Deterministic parameter init mirroring the PyTorch module's shapes."""
    k_emb, k_w, k_b = jax.random.split(key, 3)
    # nn.Embedding(26, 5): N(0, 1)
    emb_table = jax.random.normal(k_emb, (N_SYMBOL, N_HID), dtype=jnp.float32)
    # nn.Linear(5, 26): U(-1/sqrt(5), 1/sqrt(5))
    bound = 1.0 / jnp.sqrt(jnp.float32(N_HID))
    out_weight = jax.random.uniform(
        k_w, (N_SYMBOL, N_HID), minval=-bound, maxval=bound, dtype=jnp.float32)
    out_bias = jax.random.uniform(
        k_b, (N_SYMBOL,), minval=-bound, maxval=bound, dtype=jnp.float32)
    return emb_table, out_weight, out_bias


def _reference(x, emb_table, out_weight, out_bias):
    ref_logits = emb_table[x] @ out_weight.T + out_bias
    return jax.nn.log_softmax(ref_logits, axis=1)


if __name__ == "__main__":
    key = jax.random.PRNGKey(0)
    k_params, k_x1, k_x2 = jax.random.split(key, 3)
    emb_table, out_weight, out_bias = init_params(k_params)

    # Small batch (single tile, padded to 128 lanes).
    B1 = 8
    x1 = jax.random.randint(k_x1, (B1,), 0, N_SYMBOL, dtype=jnp.int32)
    out1 = jax.block_until_ready(net_forward(x1, emb_table, out_weight, out_bias))
    ref1 = _reference(x1, emb_table, out_weight, out_bias)
    assert out1.shape == (B1, N_SYMBOL)
    assert jnp.allclose(out1, ref1, atol=1e-5, rtol=1e-5)
    assert jnp.allclose(jnp.exp(out1).sum(axis=1), 1.0, atol=1e-5)

    # Larger, non-aligned batch exercising multiple grid tiles + padding.
    B2 = 2125
    x2 = jax.random.randint(k_x2, (B2,), 0, N_SYMBOL, dtype=jnp.int32)
    out2 = jax.block_until_ready(net_forward(x2, emb_table, out_weight, out_bias))
    ref2 = _reference(x2, emb_table, out_weight, out_bias)
    assert out2.shape == (B2, N_SYMBOL)
    assert jnp.allclose(out2, ref2, atol=1e-5, rtol=1e-5)

    print("KERNEL_OK")
</pallas_src>

<mosaic_0001>
module attributes {stable_mosaic.version = 11 : i64} {
  func.func @_gather_kernel(%arg0: i32, %arg1: memref<1x128xi32, #tpu.memory_space<vmem>>, %arg2: memref<128x128xf32, #tpu.memory_space<vmem>>, %arg3: memref<128x128xf32, #tpu.memory_space<vmem>>) attributes {dimension_semantics = [#tpu.dimension_semantics<parallel>], iteration_bounds = array<i64: 1>, scalar_prefetch = 0 : i64, scratch_operands = 0 : i64, tpu.core_type = #tpu.core_type<tc>, window_params = [{transform_indices = @transform_0, window_bounds = array<i64: 1, 128>}, {pipeline_mode = #tpu.pipeline_mode<synchronous>, transform_indices = @transform_1, window_bounds = array<i64: 128, 128>}, {transform_indices = @transform_2, window_bounds = array<i64: 128, 128>}]} {
    %0 = tpu.iota {dimensions = array<i32: 0>} : vector<128x128xi32>
    %c0 = arith.constant 0 : index
    %c0_0 = arith.constant 0 : index
    %1 = vector.load %arg1[%c0, %c0_0] : memref<1x128xi32, #tpu.memory_space<vmem>>, vector<1x128xi32>
    %2 = vector.broadcast %1 : vector<1x128xi32> to vector<128x128xi32>
    %3 = arith.cmpi eq, %0, %2 : vector<128x128xi32>
    %4 = arith.extui %3 : vector<128x128xi1> to vector<128x128xi32>
    %5 = arith.sitofp %4 : vector<128x128xi32> to vector<128x128xf32>
    %c0_1 = arith.constant 0 : index
    %c0_2 = arith.constant 0 : index
    %6 = vector.load %arg2[%c0_1, %c0_2] : memref<128x128xf32, #tpu.memory_space<vmem>>, vector<128x128xf32>
    %cst = arith.constant dense<0.000000e+00> : vector<128x128xf32>
    %7 = tpu.matmul %6, %5, %cst {dimension_numbers = #tpu.dot_dimension_numbers<[1], [0], [0], [1], [0, 0, 1, 1], [], []>} : vector<128x128xf32>, vector<128x128xf32>, vector<128x128xf32> -> vector<128x128xf32>
    %c0_3 = arith.constant 0 : index
    %c0_4 = arith.constant 0 : index
    %8 = vector.load %arg3[%c0_3, %c0_4] : memref<128x128xf32, #tpu.memory_space<vmem>>, vector<128x128xf32>
    tpu.vector_store %arg3[%c0_3, %c0_4], %7 {strides = array<i32>} : memref<128x128xf32, #tpu.memory_space<vmem>>, vector<128x128xf32>,
    return
  }
  func.func @transform_0(%arg0: i32) -> (i32, i32) {
    %c0_i32 = arith.constant 0 : i32
    %c0_i32_0 = arith.constant 0 : i32
    return %c0_i32, %arg0 : i32, i32
  }
  func.func @transform_1(%arg0: i32) -> (i32, i32) {
    %c0_i32 = arith.constant 0 : i32
    %c0_i32_0 = arith.constant 0 : i32
    %c0_i32_1 = arith.constant 0 : i32
    return %c0_i32, %c0_i32_0 : i32, i32
  }
  func.func @transform_2(%arg0: i32) -> (i32, i32) {
    %c0_i32 = arith.constant 0 : i32
    %c0_i32_0 = arith.constant 0 : i32
    return %c0_i32, %arg0 : i32, i32
  }
}

</mosaic_0001>

<bundles_post_ra>
// kernel: tpu_custom_call.1
= control target key start
LH: loop header
LB: loop body
LE: loop exit
PB: predicated region body
PF: predicated region fallthrough
CT: control target
= control target key end

     0   :  { %7 = vsyncpa [#allocation3], 0  ;;  %s638_s0 = inlined_call_operand.hbm [shape: s32[1,128], index: 0, kind: input, shape index: {}]   ;;  %s639_s1 = inlined_call_operand.hbm [shape: f32[128,128], index: 1, kind: input, shape index: {}]   ;;  %s640_s2 = inlined_call_operand.hbm [shape: f32[128,128], index: 2, kind: output, shape index: {}]  }
   0x1   :  { %8 = vsyncpa [#allocation6], 0 }
   0x2   :  { %9 = vsyncpa [#allocation4], 0  ;;  %s550_s9 = smov [#allocation2]   ;;  %s551_s11 = smov [#allocation5]  }
   0x3   :  { %s16_s10 = sshll.u32 %s550_s9, 4  ;;  %s25_s12 = sshll.u32 %s551_s11, 4  ;;  %s17_s10 = int_to_ptr.vmem [resolvable:$true] %s16_s10  ;;  %s571_s12 = int_to_ptr.vmem [resolvable:$true] %s25_s12 }
   0x4   :  { %s478_s15 = scalar_lea.hbm %s638_s0, 16 }
   0x5   :  { %p479_p0 = scmp.ne.s32.totalorder %s638_s0, %s478_s15  ;;  %p482_p1 = scmp.lt.u32.totalorder %s478_s15, %s638_s0 }
   0x7   :  { %p484_p2 = pnand %p482_p1, %p479_p0 }
   0x9   :  { %487 = shalt.err (!%p484_p2)
}
   0xa   :  { %s488_s20 = scalar_lea.vmem %s17_s10, 16  ;;  %s492_s21 = scalar_lea.vmem %s17_s10, 32 }
   0xb   :  { %p489_p3 = scmp.ne.s32.totalorder %s17_s10, %s488_s20  ;;  %p493_p4 = scmp.lt.s32.totalorder %s17_s10, %s17_s10 }
   0xc   :  { %p494_p5 = scmp.lt.s32.totalorder %s492_s21, %s488_s20 }
   0xe   :  { %p495_p6 = por %p494_p5, %p493_p4 }
  0x10   :  { %p496_p7 = pnand %p495_p6, %p489_p3 }
  0x12   :  { %499 = shalt.err (!%p496_p7)
}
  0x13   :  { %19 = dma.hbm_to_vmem [thread:$0]  %s638_s0, 16, %s17_s10, [#allocation3]  }
  0x14   :  { %s500_s26 = scalar_lea.hbm %s639_s1, 2048 }
  0x15   :  { %p501_p8 = scmp.ne.s32.totalorder %s639_s1, %s500_s26  ;;  %p504_p9 = scmp.lt.u32.totalorder %s500_s26, %s639_s1 }
  0x17   :  { %p506_p10 = pnand %p504_p9, %p501_p8 }
  0x19   :  { %509 = shalt.err (!%p506_p10)
}
  0x1a   :  { %s510_s3 = scalar_lea.vmem %s571_s12, 2048  ;;  %p515_p12 = scmp.lt.s32.totalorder %s571_s12, %s571_s12 }
  0x1b   :  { %p511_p11 = scmp.ne.s32.totalorder %s571_s12, %s510_s3  ;;  %p516_p13 = scmp.lt.s32.totalorder %s510_s3, %s510_s3 }
  0x1d   :  { %p517_p0 = por %p516_p13, %p515_p12 }
  0x1f   :  { %p518_p1 = pnand %p517_p0, %p511_p11 }
  0x21   :  { %521 = shalt.err (!%p518_p1)
}
  0x22   :  { %s552_s0 = smov 128   ;;  %s553_s4 = smov 8  }
  0x23   :  { %31 = dma.hbm_to_vmem [thread:$0]  %s639_s1, 2048, %s571_s12, [#allocation6], %s552_s0, %s552_s0, %s553_s4  }
  0x24   :  { %544 = dma.done.wait [#allocation3], 16  }
  0x25   :  { %545 = vsyncadd [#allocation3], 4294967280 }
  0x26   :  { %546 = dma.done.wait [#allocation6], 2048  }
  0x27   :  { %547 = vsyncadd [#allocation6], 4294965248  ;;  %v38_v0 = vlaneseq  ;;  %v605_v7 = vld [vmem:[#allocation2] ss:$0 sm:$0xff]  ;;  %v108_v8 = vld [vmem:[#allocation5] sm:$0xff]  ;;  %s555_s1 = smov [#allocation7]  }
  0x28   :  { %400 = vmatprep.mubr.f32.mxu0 %v108_v8  ;;  %v116_v9 = vld [vmem:[#allocation5 + $0x40] sm:$0xff]  ;;  %v554_v10 = vmov 1.0|1.0   ;;  %v109_v21 = vld [vmem:[#allocation5 + $0x8] sm:$0xff]  ;;  %v110_v23 = vld [vmem:[#allocation5 + $0x10] sm:$0xff]  ;;  %s290_s7 = sshll.u32 %s555_s1, 4  ;;  %s291_s7 = int_to_ptr.vmem [resolvable:$true] %s290_s7 }
  0x29   :  { %v39_v1 = vshrl.u32 %v38_v0, 7  ;;  %412 = vmatprep.mubr.f32.mxu1 %v116_v9  ;;  %v117_v22 = vld [vmem:[#allocation5 + $0x48] sm:$0xff]  ;;  %v118_v24 = vld [vmem:[#allocation5 + $0x50] sm:$0xff]  ;;  %v111_v25 = vld [vmem:[#allocation5 + $0x18] sm:$0xff]  ;;  %s522_s8 = scalar_lea.vmem %s291_s7, 2048  ;;  %p527_p3 = scmp.lt.s32.totalorder %s291_s7, %s291_s7 }
  0x2a   :  { %v119_v26 = vld [vmem:[#allocation5 + $0x58] sm:$0xff]  ;;  %v112_v27 = vld [vmem:[#allocation5 + $0x20] sm:$0xff]  ;;  %v113_v29 = vld [vmem:[#allocation5 + $0x28] sm:$0xff]  ;;  %p523_p2 = scmp.ne.s32.totalorder %s291_s7, %s522_s8  ;;  %p528_p4 = scmp.lt.s32.totalorder %s522_s8, %s522_s8 }
  0x2b   :  { %v40_v2 = vadd.s32 8, %v39_v1  ;;  %v41_v3 = vadd.s32 16, %v39_v1  ;;  %v42_v4 = vadd.s32 24, %v39_v1  ;;  %v43_v5 = vadd.s32 32, %v39_v1  ;;  %v120_v28 = vld [vmem:[#allocation5 + $0x60] sm:$0xff]  ;;  %v121_v30 = vld [vmem:[#allocation5 + $0x68] sm:$0xff] }
  0x2c   :  { %v44_v6 = vadd.s32 40, %v39_v1  ;;  %vm60_vm0 = vcmp.eq.s32.totalorder %v39_v1, %v605_v7  ;;  %v45_v11 = vadd.s32 48, %v39_v1  ;;  %v46_v12 = vadd.s32 56, %v39_v1  ;;  %v114_v31 = vld [vmem:[#allocation5 + $0x30] sm:$0xff]  ;;  %v115_v33 = vld [vmem:[#allocation5 + $0x38] sm:$0xff]  ;;  %p529_p5 = por %p528_p4, %p527_p3 }
  0x2d   :  { %vm61_vm1 = vcmp.eq.s32.totalorder %v40_v2, %v605_v7  ;;  %vm62_vm2 = vcmp.eq.s32.totalorder %v41_v3, %v605_v7  ;;  %vm63_vm3 = vcmp.eq.s32.totalorder %v42_v4, %v605_v7  ;;  %vm64_vm6 = vcmp.eq.s32.totalorder %v43_v5, %v605_v7  ;;  %v122_v32 = vld [vmem:[#allocation5 + $0x70] sm:$0xff]  ;;  %v123_v34 = vld [vmem:[#allocation5 + $0x78] sm:$0xff] }
  0x2e   :  { %vm424_vm4 = vmpackc.low %vm61_vm1, %vm60_vm0  ;;  %vm65_vm7 = vcmp.eq.s32.totalorder %v44_v6, %v605_v7  ;;  %vm66_vm9 = vcmp.eq.s32.totalorder %v45_v11, %v605_v7  ;;  %vm67_vm10 = vcmp.eq.s32.totalorder %v46_v12, %v605_v7  ;;  %v47_v13 = vadd.s32 64, %v39_v1  ;;  %p530_p6 = pnand %p529_p5, %p523_p2 }
  0x2f   :  { %425 = vmatprep.subr.msk.bf16.mxu0 %vm424_vm4, %v554_v10  ;;  %456 = vmatprep.subr.msk.bf16.mxu1 %vm424_vm4, %v554_v10  ;;  %vm428_vm5 = vmpackc.low %vm63_vm3, %vm62_vm2  ;;  %v48_v14 = vadd.s32 72, %v39_v1  ;;  %v49_v15 = vadd.s32 80, %v39_v1  ;;  %v50_v16 = vadd.s32 88, %v39_v1  ;;  %v51_v17 = vadd.s32 96, %v39_v1 }
  0x30   :  { %427 = vmatpush3.bf16.msk.msra.mxu0 %vm424_vm4, %v554_v10  ;;  %464 = vmatpush3.bf16.msk.msra.mxu1 %vm424_vm4, %v554_v10  ;;  %vm432_vm8 = vmpackc.low %vm65_vm7, %vm64_vm6  ;;  %vm68_vm12 = vcmp.eq.s32.totalorder %v47_v13, %v605_v7  ;;  %v52_v18 = vadd.s32 104, %v39_v1  ;;  %v53_v19 = vadd.s32 112, %v39_v1  ;;  %v54_v20 = vadd.s32 120, %v39_v1 }
  0x31   :  { %429 = vmatprep.subr.msk.bf16.mxu0 %vm428_vm5, %v554_v10  ;;  %457 = vmatprep.subr.msk.bf16.mxu1 %vm428_vm5, %v554_v10  ;;  %vm436_vm11 = vmpackc.low %vm67_vm10, %vm66_vm9  ;;  %vm69_vm13 = vcmp.eq.s32.totalorder %v48_v14, %v605_v7  ;;  %vm70_vm15 = vcmp.eq.s32.totalorder %v49_v15, %v605_v7  ;;  %vm71_vm0 = vcmp.eq.s32.totalorder %v50_v16, %v605_v7 }
  0x32   :  { %vm440_vm14 = vmpackc.low %vm69_vm13, %vm68_vm12  ;;  %vm72_vm2 = vcmp.eq.s32.totalorder %v51_v17, %v605_v7  ;;  %vm73_vm3 = vcmp.eq.s32.totalorder %v52_v18, %v605_v7  ;;  %vm75_vm6 = vcmp.eq.s32.totalorder %v54_v20, %v605_v7 }
  0x33   :  { %vm444_vm1 = vmpackc.low %vm71_vm0, %vm70_vm15 }
  0x34   :  { %431 = vmatpush3.bf16.msk.msra.mxu0 %vm428_vm5, %v554_v10  ;;  %465 = vmatpush3.bf16.msk.msra.mxu1 %vm428_vm5, %v554_v10  ;;  %vm448_vm4 = vmpackc.low %vm73_vm3, %vm72_vm2  ;;  %vm74_vm5 = vcmp.eq.s32.totalorder %v53_v19, %v605_v7 }
  0x35   :  { %433 = vmatprep.subr.msk.bf16.mxu0 %vm432_vm8, %v554_v10  ;;  %458 = vmatprep.subr.msk.bf16.mxu1 %vm432_vm8, %v554_v10  ;;  %vm452_vm7 = vmpackc.low %vm75_vm6, %vm74_vm5 }
  0x38   :  { %435 = vmatpush3.bf16.msk.msra.mxu0 %vm432_vm8, %v554_v10  ;;  %466 = vmatpush3.bf16.msk.msra.mxu1 %vm432_vm8, %v554_v10 }
  0x39   :  { %437 = vmatprep.subr.msk.bf16.mxu0 %vm436_vm11, %v554_v10  ;;  %459 = vmatprep.subr.msk.bf16.mxu1 %vm436_vm11, %v554_v10 }
  0x3c   :  { %439 = vmatpush3.bf16.msk.msra.mxu0 %vm436_vm11, %v554_v10  ;;  %467 = vmatpush3.bf16.msk.msra.mxu1 %vm436_vm11, %v554_v10 }
  0x3d   :  { %441 = vmatprep.subr.msk.bf16.mxu0 %vm440_vm14, %v554_v10  ;;  %460 = vmatprep.subr.msk.bf16.mxu1 %vm440_vm14, %v554_v10 }
  0x40   :  { %443 = vmatpush3.bf16.msk.msra.mxu0 %vm440_vm14, %v554_v10  ;;  %468 = vmatpush3.bf16.msk.msra.mxu1 %vm440_vm14, %v554_v10 }
  0x41   :  { %445 = vmatprep.subr.msk.bf16.mxu0 %vm444_vm1, %v554_v10  ;;  %461 = vmatprep.subr.msk.bf16.mxu1 %vm444_vm1, %v554_v10 }
  0x44   :  { %447 = vmatpush3.bf16.msk.msra.mxu0 %vm444_vm1, %v554_v10  ;;  %469 = vmatpush3.bf16.msk.msra.mxu1 %vm444_vm1, %v554_v10 }
  0x45   :  { %449 = vmatprep.subr.msk.bf16.mxu0 %vm448_vm4, %v554_v10  ;;  %462 = vmatprep.subr.msk.bf16.mxu1 %vm448_vm4, %v554_v10 }
  0x48   :  { %451 = vmatpush3.bf16.msk.msra.mxu0 %vm448_vm4, %v554_v10  ;;  %470 = vmatpush3.bf16.msk.msra.mxu1 %vm448_vm4, %v554_v10 }
  0x49   :  { %453 = vmatprep.subr.msk.bf16.mxu0 %vm452_vm7, %v554_v10  ;;  %463 = vmatprep.subr.msk.bf16.mxu1 %vm452_vm7, %v554_v10 }
  0x4c   :  { %455 = vmatpush3.bf16.msk.msra.mxu0 %vm452_vm7, %v554_v10  ;;  %471 = vmatpush3.bf16.msk.msra.mxu1 %vm452_vm7, %v554_v10 }
  0x4f   :  { %401 = vmatmul.mubr.f32.vlgmr.msra.gmra.mrb[0].mxu0 %v109_v21  ;;  %413 = vmatmul.mubr.f32.vlgmr.msra.gmra.mrb[0].mxu1 %v117_v22 }
  0x50   :  { %403 = vmatprep.mubr.f32.mxu0 %v110_v23  ;;  %415 = vmatprep.mubr.f32.mxu1 %v118_v24 }
  0x53   :  { %404 = vmatmul.mubr.f32.gmra.mrb[2].mxu0 %v111_v25  ;;  %416 = vmatmul.mubr.f32.gmra.mrb[2].mxu1 %v119_v26 }
  0x54   :  { %406 = vmatprep.mubr.f32.mxu0 %v112_v27  ;;  %418 = vmatprep.mubr.f32.mxu1 %v120_v28 }
  0x57   :  { %407 = vmatmul.mubr.f32.gmra.mrb[4].mxu0 %v113_v29  ;;  %419 = vmatmul.mubr.f32.gmra.mrb[4].mxu1 %v121_v30 }
  0x58   :  { %409 = vmatprep.mubr.f32.mxu0 %v114_v31  ;;  %421 = vmatprep.mubr.f32.mxu1 %v122_v32 }
  0x5b   :  { %410 = vmatmul.mubr.f32.gmra.mrb[6].mxu0 %v115_v33  ;;  %422 = vmatmul.mubr.f32.gmra.mrb[6].mxu1 %v123_v34 }
 0x122   :  { %v402_v35 = vpop.f32.mrb[0].mxu0  ;;  %v414_v36 = vpop.f32.mrb[0].mxu1 }
 0x123   :  { %270 = vst [vmem:[#allocation7 + $0x8] sm:$0xff] %v402_v35  ;;  %278 = vst [vmem:[#allocation7 + $0x48] sm:$0xff] %v414_v36  ;;  %v190_v37 = vpop.f32.mrb[1].mxu0  ;;  %v230_v38 = vpop.f32.mrb[1].mxu1 }
 0x124   :  { %269 = vst [vmem:[#allocation7] sm:$0xff] %v190_v37  ;;  %277 = vst [vmem:[#allocation7 + $0x40] sm:$0xff] %v230_v38 }
 0x126   :  { %v405_v39 = vpop.f32.mrb[2].mxu0  ;;  %v417_v40 = vpop.f32.mrb[2].mxu1 }
 0x127   :  { %272 = vst [vmem:[#allocation7 + $0x18] sm:$0xff] %v405_v39  ;;  %280 = vst [vmem:[#allocation7 + $0x58] sm:$0xff] %v417_v40  ;;  %v200_v41 = vpop.f32.mrb[3].mxu0  ;;  %v240_v42 = vpop.f32.mrb[3].mxu1 }
 0x128   :  { %271 = vst [vmem:[#allocation7 + $0x10] sm:$0xff] %v200_v41  ;;  %279 = vst [vmem:[#allocation7 + $0x50] sm:$0xff] %v240_v42 }
 0x12a   :  { %v408_v43 = vpop.f32.mrb[4].mxu0  ;;  %v420_v44 = vpop.f32.mrb[4].mxu1 }
 0x12b   :  { %274 = vst [vmem:[#allocation7 + $0x28] sm:$0xff] %v408_v43  ;;  %282 = vst [vmem:[#allocation7 + $0x68] sm:$0xff] %v420_v44  ;;  %v210_v45 = vpop.f32.mrb[5].mxu0  ;;  %v250_v46 = vpop.f32.mrb[5].mxu1 }
 0x12c   :  { %273 = vst [vmem:[#allocation7 + $0x20] sm:$0xff] %v210_v45  ;;  %281 = vst [vmem:[#allocation7 + $0x60] sm:$0xff] %v250_v46 }
 0x12e   :  { %v411_v47 = vpop.f32.mrb[6].mxu0  ;;  %v423_v48 = vpop.f32.mrb[6].mxu1 }
 0x12f   :  { %276 = vst [vmem:[#allocation7 + $0x38] sm:$0xff] %v411_v47  ;;  %284 = vst [vmem:[#allocation7 + $0x78] sm:$0xff] %v423_v48  ;;  %v220_v49 = vpop.f32.mrb[7].mxu0  ;;  %v260_v50 = vpop.f32.mrb[7].mxu1 }
 0x130   :  { %275 = vst [vmem:[#allocation7 + $0x30] sm:$0xff] %v220_v49  ;;  %283 = vst [vmem:[#allocation7 + $0x70] sm:$0xff] %v260_v50 }
 0x131   :  { %533 = shalt.err (!%p530_p6)
}
 0x132   :  { %s534_s11 = scalar_lea.hbm %s640_s2, 2048 }
 0x133   :  { %p535_p7 = scmp.ne.s32.totalorder %s640_s2, %s534_s11  ;;  %p538_p8 = scmp.lt.u32.totalorder %s534_s11, %s640_s2 }
 0x135   :  { %p540_p9 = pnand %p538_p8, %p535_p7 }
 0x137   :  { %543 = shalt.err (!%p540_p9)
}
 0x138   :  { %296 = dma.vmem_to_hbm [thread:$0]  %s291_s7, 2048, %s640_s2, [#allocation4], %s552_s0, %s552_s0, %s553_s4  }
 0x139   :  { %548 = dma.done.wait [#allocation4], 2048  }
 0x13a   :  { %549 = vsyncadd [#allocation4], 4294965248 }
 0x13b   :  { %300 = vsyncpa [#allocation3], 1 }
 0x13c   :  { %301 = vsyncpa [#allocation6], 1 }
 0x13d   :  { %302 = vsyncpa [#allocation4], 1 }

</bundles_post_ra>
